<compile_context>
chip_gen: v5e
topology: v5e:2x2
jax: 0.10.0
libtpu: 0.0.40
codegen_flags: <defaults>
</compile_context>

<pallas_src>
import jax
import jax.numpy as jnp
from jax.experimental import pallas as pl
from jax.experimental.pallas import tpu as pltpu


def rnn_cell_kernel(x_ref, h_ref, wx_ref, wh_ref, b_ref, fused_ref):
    # fused = x @ Wx + h @ Wh + b      (Wx/Wh are the top/bottom rows of the
    # fused-and-padded [I+H, N_pad] weight, so this equals cat(x,h) @ W + b
    # without any in-kernel lane-axis concatenation)
    acc = jnp.dot(x_ref[...], wx_ref[...], preferred_element_type=jnp.float32)
    acc = acc + jnp.dot(h_ref[...], wh_ref[...],
                        preferred_element_type=jnp.float32)
    fused_ref[...] = acc + b_ref[...]


def prepare_fused_params(w_ih_t, b_ih, w_io_t, b_io, input_size):
    """Fuse i2h and i2o into one weight slab and pad columns to a multiple
    of 128 so the kernel's output store is lane-dense (unmasked).

    w_*_t : [in_features, out_features] (already transposed)
    b_*   : [1, out_features]
    Returns (w_x [I, N_pad], w_h [H, N_pad], b [1, N_pad], N_pad).
    """
    I = input_size
    H = w_ih_t.shape[1]
    O = w_io_t.shape[1]
    N = H + O
    N_pad = max(128, ((N + 127) // 128) * 128)

    w_fused = jnp.concatenate([w_ih_t, w_io_t], axis=1)        # [I+H, N]
    b_fused = jnp.concatenate([b_ih, b_io], axis=1)            # [1,   N]
    pad = N_pad - N
    if pad:
        w_fused = jnp.pad(w_fused, ((0, 0), (0, pad)))
        b_fused = jnp.pad(b_fused, ((0, 0), (0, pad)))

    w_x = w_fused[:I, :]                                       # [I, N_pad]
    w_h = w_fused[I:, :]                                       # [H, N_pad]
    return w_x, w_h, b_fused, N_pad


def rnn_forward(x, h, w_x, w_h, b_fused):
    """Single fused pallas_call producing the [B, N_pad] slab, then slice."""
    B, I = x.shape
    _, H = h.shape
    N_pad = w_x.shape[1]

    fused = pl.pallas_call(
        rnn_cell_kernel,
        out_shape=jax.ShapeDtypeStruct((B, N_pad), jnp.float32),
        # Whole-array blocks (block_shape == full array dims, so the (8,128)
        # tiling constraint does not apply; everything fits in VMEM easily).
        in_specs=[
            pl.BlockSpec((B, I), lambda: (0, 0)),
            pl.BlockSpec((B, H), lambda: (0, 0)),
            pl.BlockSpec((I, N_pad), lambda: (0, 0)),
            pl.BlockSpec((H, N_pad), lambda: (0, 0)),
            pl.BlockSpec((1, N_pad), lambda: (0, 0)),
        ],
        out_specs=pl.BlockSpec((B, N_pad), lambda: (0, 0)),
    )(x, h, w_x, w_h, b_fused)
    return fused


def rnn_cell(x, h, w_x, w_h, b_fused, hidden_size, output_size):
    fused = rnn_forward(x, h, w_x, w_h, b_fused)
    h_new = fused[:, :hidden_size]
    out = fused[:, hidden_size:hidden_size + output_size]
    return out, h_new


def init_linear_params(key, in_features, out_features):
    """Deterministic init mimicking nn.Linear (uniform +/- 1/sqrt(fan_in)).
    Returns weight already transposed to [in_features, out_features]."""
    k_w, k_b = jax.random.split(key)
    bound = 1.0 / jnp.sqrt(jnp.float32(in_features))
    w_t = jax.random.uniform(k_w, (in_features, out_features),
                             dtype=jnp.float32, minval=-bound, maxval=bound)
    b = jax.random.uniform(k_b, (1, out_features),
                           dtype=jnp.float32, minval=-bound, maxval=bound)
    return w_t, b


if __name__ == "__main__":
    # Small shapes consistent with the module: batch=2, input=16, hidden=32, output=1
    B, INPUT_SIZE, HIDDEN_SIZE, OUTPUT_SIZE = 2, 16, 32, 1

    key = jax.random.PRNGKey(0)
    k_x, k_h, k_ih, k_io = jax.random.split(key, 4)

    x = jax.random.normal(k_x, (B, INPUT_SIZE), dtype=jnp.float32)
    h = jax.random.normal(k_h, (B, HIDDEN_SIZE), dtype=jnp.float32)

    w_ih_t, b_ih = init_linear_params(k_ih, INPUT_SIZE + HIDDEN_SIZE, HIDDEN_SIZE)
    w_io_t, b_io = init_linear_params(k_io, INPUT_SIZE + HIDDEN_SIZE, OUTPUT_SIZE)

    # Host-side one-time fusion + lane padding of the parameters.
    w_x, w_h, b_fused, _ = prepare_fused_params(
        w_ih_t, b_ih, w_io_t, b_io, INPUT_SIZE)

    out, h_new = rnn_cell(x, h, w_x, w_h, b_fused, HIDDEN_SIZE, OUTPUT_SIZE)
    jax.block_until_ready((out, h_new))

    # Pure-JAX reference with the original (unfused) semantics.
    combined = jnp.concatenate([x, h], axis=1)
    ref_h = combined @ w_ih_t + b_ih
    ref_o = combined @ w_io_t + b_io
    assert out.shape == (B, OUTPUT_SIZE) and h_new.shape == (B, HIDDEN_SIZE)
    assert jnp.allclose(out, ref_o, atol=1e-5), "output mismatch"
    assert jnp.allclose(h_new, ref_h, atol=1e-5), "hidden mismatch"

    print("KERNEL_OK")
</pallas_src>

<mosaic_0001>
module attributes {stable_mosaic.version = 11 : i64} {
  func.func @rnn_cell_kernel(%arg0: memref<2x16xf32, #tpu.memory_space<vmem>>, %arg1: memref<2x32xf32, #tpu.memory_space<vmem>>, %arg2: memref<16x128xf32, #tpu.memory_space<vmem>>, %arg3: memref<32x128xf32, #tpu.memory_space<vmem>>, %arg4: memref<1x128xf32, #tpu.memory_space<vmem>>, %arg5: memref<2x128xf32, #tpu.memory_space<vmem>>) attributes {dimension_semantics = [], scalar_prefetch = 0 : i64, scratch_operands = 0 : i64, tpu.core_type = #tpu.core_type<tc>} {
    %c0 = arith.constant 0 : index
    %c0_0 = arith.constant 0 : index
    %0 = vector.load %arg0[%c0, %c0_0] : memref<2x16xf32, #tpu.memory_space<vmem>>, vector<2x16xf32>
    %c0_1 = arith.constant 0 : index
    %c0_2 = arith.constant 0 : index
    %1 = vector.load %arg2[%c0_1, %c0_2] : memref<16x128xf32, #tpu.memory_space<vmem>>, vector<16x128xf32>
    %cst = arith.constant dense<0.000000e+00> : vector<2x128xf32>
    %2 = tpu.matmul %0, %1, %cst {dimension_numbers = #tpu.dot_dimension_numbers<[1], [0], [0], [1], [0, 0, 1, 1], [], []>} : vector<2x16xf32>, vector<16x128xf32>, vector<2x128xf32> -> vector<2x128xf32>
    %c0_3 = arith.constant 0 : index
    %c0_4 = arith.constant 0 : index
    %3 = vector.load %arg1[%c0_3, %c0_4] : memref<2x32xf32, #tpu.memory_space<vmem>>, vector<2x32xf32>
    %c0_5 = arith.constant 0 : index
    %c0_6 = arith.constant 0 : index
    %4 = vector.load %arg3[%c0_5, %c0_6] : memref<32x128xf32, #tpu.memory_space<vmem>>, vector<32x128xf32>
    %cst_7 = arith.constant dense<0.000000e+00> : vector<2x128xf32>
    %5 = tpu.matmul %3, %4, %cst_7 {dimension_numbers = #tpu.dot_dimension_numbers<[1], [0], [0], [1], [0, 0, 1, 1], [], []>} : vector<2x32xf32>, vector<32x128xf32>, vector<2x128xf32> -> vector<2x128xf32>
    %6 = arith.addf %2, %5 : vector<2x128xf32>
    %c0_8 = arith.constant 0 : index
    %c0_9 = arith.constant 0 : index
    %7 = vector.load %arg4[%c0_8, %c0_9] : memref<1x128xf32, #tpu.memory_space<vmem>>, vector<1x128xf32>
    %8 = vector.broadcast %7 : vector<1x128xf32> to vector<2x128xf32>
    %9 = arith.addf %6, %8 : vector<2x128xf32>
    %c0_10 = arith.constant 0 : index
    %c0_11 = arith.constant 0 : index
    %10 = vector.load %arg5[%c0_10, %c0_11] : memref<2x128xf32, #tpu.memory_space<vmem>>, vector<2x128xf32>
    tpu.vector_store %arg5[%c0_10, %c0_11], %9 {strides = array<i32>} : memref<2x128xf32, #tpu.memory_space<vmem>>, vector<2x128xf32>,
    return
  }
}

</mosaic_0001>

<bundles_post_ra>
// kernel: tpu_custom_call.1
= control target key start
LH: loop header
LB: loop body
LE: loop exit
PB: predicated region body
PF: predicated region fallthrough
CT: control target
= control target key end

     0   :  { %10 = vsyncpa [#allocation3], 0  ;;  %s354_s0 = inlined_call_operand.hbm [shape: f32[2,16], index: 0, kind: input, shape index: {}]   ;;  %s355_s1 = inlined_call_operand.hbm [shape: f32[2,32], index: 1, kind: input, shape index: {}]   ;;  %s356_s2 = inlined_call_operand.hbm [shape: f32[16,128], index: 2, kind: input, shape index: {}]   ;;  %s357_s3 = inlined_call_operand.hbm [shape: f32[32,128], index: 3, kind: input, shape index: {}]   ;;  %s358_s4 = inlined_call_operand.vmem [shape: f32[1,128], index: 4, kind: input, shape index: {}]   ;;  %s359_s5 = inlined_call_operand.hbm [shape: f32[2,128], index: 5, kind: output, shape index: {}]  }
   0x1   :  { %11 = vsyncpa [#allocation6], 0 }
   0x2   :  { %12 = vsyncpa [#allocation9], 0  ;;  %s30_s20 = sshll.u32 %s355_s1, 4  ;;  %s31_s20 = int_to_ptr.hbm [resolvable:$true] %s30_s20 }
   0x3   :  { %13 = vsyncpa [#allocation4], 0  ;;  %s299_s21 = smov [#allocation5]   ;;  %s19_s25 = sshll.u32 %s354_s0, 4  ;;  %s20_s25 = int_to_ptr.hbm [resolvable:$true] %s19_s25 }
   0x4   :  { %s32_s22 = sshll.u32 %s299_s21, 4  ;;  %s300_s26 = smov [#allocation2]   ;;  %s33_s22 = int_to_ptr.vmem [resolvable:$true] %s32_s22 }
   0x5   :  { %35 = dma.hbm_to_vmem [thread:$0]  %s31_s20, 32, %s33_s22, [#allocation6]  }
   0x6   :  { %s21_s27 = sshll.u32 %s300_s26, 4  ;;  %s40_s30 = sshll.u32 %s356_s2, 4  ;;  %s22_s27 = int_to_ptr.vmem [resolvable:$true] %s21_s27  ;;  %s41_s30 = int_to_ptr.hbm [resolvable:$true] %s40_s30 }
   0x7   :  { %24 = dma.hbm_to_vmem [thread:$0]  %s20_s25, 32, %s22_s27, [#allocation3]  }
   0x8   :  { %s301_s1 = smov [#allocation7]   ;;  %s53_s9 = sshll.u32 %s357_s3, 4  ;;  %s54_s9 = int_to_ptr.hbm [resolvable:$true] %s53_s9 }
   0x9   :  { %s42_s6 = sshll.u32 %s301_s1, 4  ;;  %s302_s10 = smov 128   ;;  %s43_s6 = int_to_ptr.vmem [resolvable:$true] %s42_s6 }
   0xa   :  { %s303_s0 = smov 8   ;;  %s304_s11 = smov [#allocation8]  }
   0xb   :  { %48 = dma.hbm_to_vmem [thread:$0]  %s41_s30, 256, %s43_s6, [#allocation6], %s302_s10, %s302_s10, %s303_s0  }
   0xc   :  { %s55_s12 = sshll.u32 %s304_s11, 4  ;;  %s56_s12 = int_to_ptr.vmem [resolvable:$true] %s55_s12 }
   0xd   :  { %61 = dma.hbm_to_vmem [thread:$0]  %s54_s9, 512, %s56_s12, [#allocation9], %s302_s10, %s302_s10, %s303_s0  }
   0xe   :  { %291 = dma.done.wait [#allocation3], 32  }
   0xf   :  { %292 = vsyncadd [#allocation3], 4294967264 }
  0x10   :  { %293 = dma.done.wait [#allocation6], 288  }
  0x11   :  { %294 = vsyncadd [#allocation6], 4294967008 }
  0x12   :  { %295 = dma.done.wait [#allocation9], 512  }
  0x13   :  { %296 = vsyncadd [#allocation9], 4294966784  ;;  %v87_v0 = vld [vmem:[#allocation8 + $0x18] sm:$0xff]  ;;  %v86_v1 = vld [vmem:[#allocation8 + $0x10] sm:$0xff]  ;;  %vm112_vm0 = vcmask 130048   ;;  %vm88_vm1 = vcmask 261120  }
  0x14   :  { %104 = vmatpush.msra.mxu0 %v87_v0  ;;  %v82_v2 = vld [vmem:[#allocation7 + $0x8] sm:$0xff]  ;;  %v81_v3 = vld [vmem:[#allocation7] sm:$0xff]  ;;  %v85_v4 = vld [vmem:[#allocation8 + $0x8] sm:$0xff]  ;;  %s305_s13 = smov [#allocation10]   ;;  %s149_s17 = sshll.u32 %s359_s5, 4  ;;  %s150_s17 = int_to_ptr.hbm [resolvable:$true] %s149_s17 }
  0x15   :  { %130 = vmatpush.msra.mxu1 %v82_v2  ;;  %v80_v5 = vld [vmem:[#allocation2] sm:$0x3]  ;;  %v84_v6 = vld [vmem:[#allocation8] sm:$0xff]  ;;  %v83_v7 = vld [vmem:[#allocation5] sm:$0x3]  ;;  %s147_s14 = sshll.u32 %s305_s13, 4  ;;  %s148_s14 = int_to_ptr.vmem [resolvable:$true] %s147_s14 }
  0x16   :  { %105 = vmatpush.msra.mxu0 %v86_v1  ;;  %v170_v9 = vld [vmem:[%s358_s4] ss:$0 sm:$0xff] }
  0x17   :  { %131 = vmatpush.msra.mxu1 %v81_v3 }
  0x18   :  { %106 = vmatpush.msra.mxu0 %v85_v4  ;;  %162 = vmatmul.msk.f32.vlgmr.msra.gmra.mxu1 %vm112_vm0, %v80_v5 }
  0x1a   :  { %107 = vmatpush.msra.mxu0 %v84_v6 }
  0x1b   :  { %161 = vmatmul.msk.f32.vlgmr.msra.gmra.mxu0 %vm88_vm1, %v83_v7 }
  0x95   :  { %v133_v8 = vpop.f32.mrf.mxu1 }
  0x98   :  { %v109_v10 = vpop.f32.mrf.mxu0 }
  0x99   :  { %v134_v11 = vadd.f32 %v133_v8, %v109_v10 }
  0x9b   :  { %v140_v12 = vadd.f32 %v170_v9, %v134_v11 }
  0x9d   :  { %141 = vst [vmem:[#allocation10] sm:$0x3] %v140_v12 }
  0x9e   :  { %152 = dma.vmem_to_hbm [thread:$0]  %s148_s14, 32, %s150_s17, [#allocation4]  }
  0x9f   :  { %297 = dma.done.wait [#allocation4], 32  }
  0xa0   :  { %298 = vsyncadd [#allocation4], 4294967264 }
  0xa1   :  { %157 = vsyncpa [#allocation3], 1 }
  0xa2   :  { %158 = vsyncpa [#allocation6], 1 }
  0xa3   :  { %159 = vsyncpa [#allocation9], 1 }
  0xa4   :  { %160 = vsyncpa [#allocation4], 1 }

</bundles_post_ra>
